<compile_context>
chip_gen: v6e
topology: v6e:2x2x1
jax: 0.10.0
libtpu: 0.0.40
codegen_flags: <defaults>
</compile_context>

<pallas_src>
import functools

import jax
import jax.numpy as jnp
from jax.experimental import pallas as pl
from jax.experimental.pallas import tpu as pltpu


def _round_up(n, m):
    return ((n + m - 1) // m) * m


_SUBLANE = 16                      # row granularity (covers f32 sublane=8 and bf16=16)
_TM_CAP = 2048                     # rows per tile cap (mem-bound knee is ~512-1024 rows)
_K_TILE = 2048                     # K-chunk (multiple of 128) for the huge-D_in path
_MIN_TM_FULL_K = 256               # if full-K forces tm below this, switch to K tiling
_VMEM_CEILING = 48 * 1024 * 1024   # < v7x 64 MiB physical; fine on v5e/v6e (128 MiB)
_BUF_BUDGET = 40 * 1024 * 1024     # budget for pipelined tiles (leaves compiler headroom)
_PALLAS_MIN_MACS = 1 << 21         # below this, a fused XLA path beats kernel overhead


# --------------------------------------------------------------------------- #
# Kernel                                                                      #
# --------------------------------------------------------------------------- #
def _lng_kernel(x_ref, w_ref, b_ref, mu_ref, v_ref, al_ref, be_ref, acc_ref, *, c):
    """grid = (batch_tiles, k_tiles); the D_in reduction is the last ('arbitrary') axis."""
    k = pl.program_id(1)

    @pl.when(k == 0)
    def _():
        acc_ref[...] = jnp.zeros_like(acc_ref)

    x = x_ref[...]
    w = w_ref[...]
    if x.dtype != w.dtype:            # bf16 weights -> run the MXU in bf16 (f32 accum)
        x = x.astype(w.dtype)
    acc_ref[...] += jnp.dot(x, w, preferred_element_type=jnp.float32)

    @pl.when(k == pl.num_programs(1) - 1)
    def _():
        # Columns are pre-grouped as [mu | logv | logalpha | logbeta], each c wide.
        y = acc_ref[...] + b_ref[...].astype(jnp.float32)
        # Numerically safe softplus == log(exp(y) + 1).
        sp = jnp.maximum(y, 0.0) + jnp.log1p(jnp.exp(-jnp.abs(y)))
        dt = mu_ref.dtype
        mu_ref[...] = y[:, 0 * c:1 * c].astype(dt)
        v_ref[...] = sp[:, 1 * c:2 * c].astype(dt)
        al_ref[...] = (sp[:, 2 * c:3 * c] + 1.0).astype(dt)
        be_ref[...] = sp[:, 3 * c:4 * c].astype(dt)


# --------------------------------------------------------------------------- #
# One-time parameter preparation (spectral norm + column regrouping)          #
# --------------------------------------------------------------------------- #
def prepare_lng_params(weight, bias, out_channels, *, n_power_iters=50, param_dtype=None):
    """weight: (4*C, D_in) PyTorch layout; bias: (4*C,).  Call once, not per step.

    Returns (w_grouped (D_in, 4C), b_grouped (1, 4C), w_sn (4C, D_in) f-norm'd weight).
    """
    C = out_channels
    out_dim, d_in = weight.shape
    assert out_dim == 4 * C

    w32 = weight.astype(jnp.float32)
    # Spectral norm via power iteration, run to convergence here (one-time cost).
    # TODO(synk): PyTorch SpectralNorm uses one cached power-iteration step per
    # training forward; to match a trained checkpoint exactly, load its stored u/v.
    v = jnp.ones((d_in,), jnp.float32) / jnp.sqrt(jnp.float32(d_in))

    def body(_, v):
        u = w32 @ v
        u = u / (jnp.linalg.norm(u) + 1e-12)
        v = w32.T @ u
        v = v / (jnp.linalg.norm(v) + 1e-12)
        return v

    v = jax.lax.fori_loop(0, n_power_iters, body, v)
    u = w32 @ v
    u = u / (jnp.linalg.norm(u) + 1e-12)
    sigma = u @ (w32 @ v)
    w_sn = (w32 / sigma).astype(weight.dtype)

    # PyTorch .view(B, C, 4): output column ch*4 + field -> (channel ch, field).
    # Regroup columns so the kernel result is [mu | logv | logalpha | logbeta],
    # each a contiguous C-wide group.
    perm = jnp.concatenate([jnp.arange(C) * 4 + k for k in range(4)])
    w_grouped = w_sn[perm, :].T                      # (D_in, 4*C)
    b_grouped = bias[perm].reshape(1, 4 * C)

    if param_dtype is not None:                      # e.g. jnp.bfloat16 for bf16 MXU
        w_grouped = w_grouped.astype(param_dtype)
        b_grouped = b_grouped.astype(param_dtype)
    return w_grouped, b_grouped, w_sn


# --------------------------------------------------------------------------- #
# Tiling plan (VMEM-budgeted row tile, megacore-friendly grid, K fallback)    #
# --------------------------------------------------------------------------- #
def _buffer_bytes(tm, tk, n_out, c, x_bytes, w_bytes, out_bytes):
    return (2 * tm * tk * x_bytes            # x tile, double-buffered
            + 2 * tk * n_out * w_bytes       # weight (resident; budget 2 bufs anyway)
            + 2 * n_out * 4                  # bias
            + 2 * 4 * tm * c * out_bytes     # four outputs, double-buffered
            + tm * n_out * 4)                # f32 accumulator scratch


def _plan_tiles(batch, d_in, n_out, c, x_bytes, w_bytes, out_bytes):
    def max_tm(tk):
        tm = _TM_CAP
        while tm > _SUBLANE and _buffer_bytes(
                tm, tk, n_out, c, x_bytes, w_bytes, out_bytes) > _BUF_BUDGET:
            tm -= _SUBLANE
        return tm

    tk = d_in                      # full-K (single reduction step) by default
    tm = max_tm(tk)
    if tm < _MIN_TM_FULL_K and d_in > _K_TILE:
        tk = _K_TILE               # K-tiled fallback for huge D_in (v7x 64 MiB VMEM)
        tm = max_tm(tk)

    # Megacore: ensure the batch axis has >= 2 (even when cheap) grid steps so
    # dimension_semantics=("parallel", ...) shards it across v7x's two TCs.
    nb = pl.cdiv(batch, tm)
    if batch >= 2 * _SUBLANE:
        if nb == 1:
            nb = 2
        elif nb % 2 == 1 and nb <= 8:
            nb += 1
    tm = min(tm, _round_up(pl.cdiv(batch, nb), _SUBLANE))
    nb = pl.cdiv(batch, tm)
    return tm, tk, nb


# --------------------------------------------------------------------------- #
# Forward wrapper                                                             #
# --------------------------------------------------------------------------- #
@functools.partial(jax.jit, static_argnames=("out_channels", "force_pallas"))
def linear_normal_gamma(x, w_grouped, b_grouped, out_channels, *, force_pallas=False):
    """x: (B, D_in); w_grouped: (D_in, 4C); b_grouped: (1, 4C).
    Returns (mu, v, alpha, beta), each (B, C) in x.dtype."""
    B, D_in = x.shape
    C = out_channels
    n_out = 4 * C
    assert w_grouped.shape == (D_in, n_out) and b_grouped.shape == (1, n_out)
    out_dtype = x.dtype

    # Tiny problems: per-step + custom-call overhead dwarfs the work -> fused XLA path.
    if not force_pallas and B * D_in * n_out < _PALLAS_MIN_MACS:
        y = jnp.dot(x, w_grouped, preferred_element_type=jnp.float32)
        y = y + b_grouped.astype(jnp.float32)
        sp = jax.nn.softplus(y)
        return (y[:, 0:C].astype(out_dtype),
                sp[:, C:2 * C].astype(out_dtype),
                (sp[:, 2 * C:3 * C] + 1.0).astype(out_dtype),
                sp[:, 3 * C:4 * C].astype(out_dtype))

    x_bytes = jnp.dtype(x.dtype).itemsize
    w_bytes = jnp.dtype(w_grouped.dtype).itemsize
    out_bytes = jnp.dtype(out_dtype).itemsize

    tm, tk, nb = _plan_tiles(B, D_in, n_out, C, x_bytes, w_bytes, out_bytes)
    B_pad = nb * tm
    d_pad = _round_up(D_in, tk)
    nk = d_pad // tk

    if B_pad != B or d_pad != D_in:
        x = jnp.pad(x, ((0, B_pad - B), (0, d_pad - D_in)))
    w = w_grouped
    if d_pad != D_in:
        w = jnp.pad(w, ((0, d_pad - D_in), (0, 0)))   # zero rows: no effect on the dot

    vmem_need = _buffer_bytes(tm, tk, n_out, C, x_bytes, w_bytes, out_bytes)
    vmem_limit = max(16 * 1024 * 1024, min(_VMEM_CEILING, int(vmem_need) + (2 << 20)))

    cost = pl.CostEstimate(
        flops=2 * B_pad * d_pad * n_out,
        transcendentals=2 * B_pad * 3 * C,
        bytes_accessed=(B_pad * d_pad * x_bytes + d_pad * n_out * w_bytes
                        + n_out * w_bytes + 4 * B_pad * C * out_bytes),
    )

    out_sds = jax.ShapeDtypeStruct((B_pad, C), out_dtype)
    mu, v, alpha, beta = pl.pallas_call(
        functools.partial(_lng_kernel, c=C),
        out_shape=(out_sds, out_sds, out_sds, out_sds),
        grid=(nb, nk),
        in_specs=[
            pl.BlockSpec((tm, tk), lambda i, k: (i, k)),       # x tile
            pl.BlockSpec((tk, n_out), lambda i, k: (k, 0)),    # weight (VMEM-resident)
            pl.BlockSpec((1, n_out), lambda i, k: (0, 0)),     # bias   (VMEM-resident)
        ],
        out_specs=tuple(pl.BlockSpec((tm, C), lambda i, k: (i, 0)) for _ in range(4)),
        scratch_shapes=[pltpu.VMEM((tm, n_out), jnp.float32)],
        compiler_params=pltpu.CompilerParams(
            dimension_semantics=("parallel", "arbitrary"),
            vmem_limit_bytes=vmem_limit),
        cost_estimate=cost,
    )(x, w, b_grouped)

    if B_pad != B:
        mu, v, alpha, beta = (t[:B] for t in (mu, v, alpha, beta))
    return mu, v, alpha, beta


# --------------------------------------------------------------------------- #
# Pure-JAX reference (mirrors the PyTorch forward, given the same w_sn)       #
# --------------------------------------------------------------------------- #
def _reference(x, w_sn, bias, out_channels):
    pred = x @ w_sn.T + bias                        # (B, 4*C)
    pred = pred.reshape(x.shape[0], -1, 4)          # (B, C, 4)
    mu, logv, loga, logb = (pred[..., i] for i in range(4))
    sp = jax.nn.softplus                            # == log(exp(z)+1)
    return mu, sp(logv), sp(loga) + 1.0, sp(logb)


if __name__ == "__main__":
    B, D_in, C = 64, 32, 4           # batch, in_channels, out_channels

    key = jax.random.PRNGKey(0)
    kx, kw, kb = jax.random.split(key, 3)

    x = jax.random.normal(kx, (B, D_in), dtype=jnp.float32)
    bound = 1.0 / (D_in ** 0.5)      # nn.Linear-style init
    weight = jax.random.uniform(kw, (4 * C, D_in), minval=-bound, maxval=bound,
                                dtype=jnp.float32)
    bias = jax.random.uniform(kb, (4 * C,), minval=-bound, maxval=bound,
                              dtype=jnp.float32)

    # One-time prep (spectral norm, column regrouping) — outside the per-call path.
    w_grouped, b_grouped, w_sn = prepare_lng_params(weight, bias, C)
    refs = _reference(x, w_sn, bias, C)

    # 1) Pallas kernel (forced: this demo shape is below the auto-dispatch cutoff).
    outs = jax.block_until_ready(
        linear_normal_gamma(x, w_grouped, b_grouped, C, force_pallas=True))
    for o, r in zip(outs, refs):
        assert o.shape == (B, C)
        assert jnp.allclose(o, r, atol=1e-5, rtol=1e-5)

    # 2) Auto dispatch: tiny shape routes to the fused XLA path; same numerics.
    outs_small = jax.block_until_ready(linear_normal_gamma(x, w_grouped, b_grouped, C))
    for o, r in zip(outs_small, refs):
        assert jnp.allclose(o, r, atol=1e-5, rtol=1e-5)

    # 3) bf16-weight MXU path (halves the matmul byte stream); looser tolerance.
    w16, b16, _ = prepare_lng_params(weight, bias, C, param_dtype=jnp.bfloat16)
    outs_bf16 = jax.block_until_ready(
        linear_normal_gamma(x, w16, b16, C, force_pallas=True))
    for o, r in zip(outs_bf16, refs):
        assert o.shape == (B, C)
        assert jnp.allclose(o, r, atol=5e-2, rtol=5e-2)

    print("KERNEL_OK")
</pallas_src>

<mosaic_0001>
module attributes {stable_mosaic.version = 11 : i64} {
  func.func @_lng_kernel(%arg0: i32, %arg1: i32, %arg2: memref<32x32xf32, #tpu.memory_space<vmem>>, %arg3: memref<32x16xf32, #tpu.memory_space<vmem>>, %arg4: memref<1x16xf32, #tpu.memory_space<vmem>>, %arg5: memref<32x4xf32, #tpu.memory_space<vmem>>, %arg6: memref<32x4xf32, #tpu.memory_space<vmem>>, %arg7: memref<32x4xf32, #tpu.memory_space<vmem>>, %arg8: memref<32x4xf32, #tpu.memory_space<vmem>>, %arg9: memref<32x16xf32, #tpu.memory_space<vmem>>) attributes {dimension_semantics = [#tpu.dimension_semantics<parallel>, #tpu.dimension_semantics<arbitrary>], iteration_bounds = array<i64: 2, 1>, scalar_prefetch = 0 : i64, scratch_operands = 1 : i64, tpu.core_type = #tpu.core_type<tc>, window_params = [{transform_indices = @transform_0, window_bounds = array<i64: 32, 32>}, {transform_indices = @transform_1, window_bounds = array<i64: 32, 16>}, {pipeline_mode = #tpu.pipeline_mode<synchronous>, transform_indices = @transform_2, window_bounds = array<i64: 1, 16>}, {transform_indices = @transform_3, window_bounds = array<i64: 32, 4>}, {transform_indices = @transform_4, window_bounds = array<i64: 32, 4>}, {transform_indices = @transform_5, window_bounds = array<i64: 32, 4>}, {transform_indices = @transform_6, window_bounds = array<i64: 32, 4>}]} {
    %c0_i32 = arith.constant 0 : i32
    %0 = arith.cmpi eq, %arg1, %c0_i32 : i32
    %1 = arith.extui %0 : i1 to i32
    %c0_i32_0 = arith.constant 0 : i32
    %2 = arith.cmpi ne, %1, %c0_i32_0 : i32
    scf.if %2 {
      %cst_10 = arith.constant 0.000000e+00 : f32
      %12 = vector.broadcast %cst_10 : f32 to vector<32x16xf32>
      %c0_11 = arith.constant 0 : index
      %c0_12 = arith.constant 0 : index
      %13 = vector.load %arg9[%c0_11, %c0_12] : memref<32x16xf32, #tpu.memory_space<vmem>>, vector<32x16xf32>
      tpu.vector_store %arg9[%c0_11, %c0_12], %12 {strides = array<i32>} : memref<32x16xf32, #tpu.memory_space<vmem>>, vector<32x16xf32>,
    } else {
    }
    %c0 = arith.constant 0 : index
    %c0_1 = arith.constant 0 : index
    %3 = vector.load %arg2[%c0, %c0_1] : memref<32x32xf32, #tpu.memory_space<vmem>>, vector<32x32xf32>
    %c0_2 = arith.constant 0 : index
    %c0_3 = arith.constant 0 : index
    %4 = vector.load %arg3[%c0_2, %c0_3] : memref<32x16xf32, #tpu.memory_space<vmem>>, vector<32x16xf32>
    %c0_4 = arith.constant 0 : index
    %c0_5 = arith.constant 0 : index
    %5 = vector.load %arg9[%c0_4, %c0_5] : memref<32x16xf32, #tpu.memory_space<vmem>>, vector<32x16xf32>
    %cst = arith.constant dense<0.000000e+00> : vector<32x16xf32>
    %6 = tpu.matmul %3, %4, %cst {dimension_numbers = #tpu.dot_dimension_numbers<[1], [0], [0], [1], [0, 0, 1, 1], [], []>} : vector<32x32xf32>, vector<32x16xf32>, vector<32x16xf32> -> vector<32x16xf32>
    %7 = arith.addf %5, %6 : vector<32x16xf32>
    %c0_6 = arith.constant 0 : index
    %c0_7 = arith.constant 0 : index
    %8 = vector.load %arg9[%c0_6, %c0_7] : memref<32x16xf32, #tpu.memory_space<vmem>>, vector<32x16xf32>
    tpu.vector_store %arg9[%c0_6, %c0_7], %7 {strides = array<i32>} : memref<32x16xf32, #tpu.memory_space<vmem>>, vector<32x16xf32>,
    %c0_i32_8 = arith.constant 0 : i32
    %9 = arith.cmpi eq, %arg1, %c0_i32_8 : i32
    %10 = arith.extui %9 : i1 to i32
    %c0_i32_9 = arith.constant 0 : i32
    %11 = arith.cmpi ne, %10, %c0_i32_9 : i32
    scf.if %11 {
      %c0_10 = arith.constant 0 : index
      %c0_11 = arith.constant 0 : index
      %12 = vector.load %arg9[%c0_10, %c0_11] : memref<32x16xf32, #tpu.memory_space<vmem>>, vector<32x16xf32>
      %c0_12 = arith.constant 0 : index
      %c0_13 = arith.constant 0 : index
      %13 = vector.load %arg4[%c0_12, %c0_13] : memref<1x16xf32, #tpu.memory_space<vmem>>, vector<1x16xf32>
      %14 = vector.broadcast %13 : vector<1x16xf32> to vector<32x16xf32>
      %15 = arith.addf %12, %14 : vector<32x16xf32>
      %cst_14 = arith.constant 0.000000e+00 : f32
      %16 = vector.broadcast %cst_14 : f32 to vector<32x16xf32>
      %17 = arith.maximumf %15, %16 : vector<32x16xf32>
      %18 = math.absf %15 : vector<32x16xf32>
      %cst_15 = arith.constant 0.000000e+00 : f32
      %19 = vector.broadcast %cst_15 : f32 to vector<32x16xf32>
      %20 = arith.subf %19, %18 : vector<32x16xf32>
      %21 = math.exp %20 : vector<32x16xf32>
      %22 = math.log1p %21 : vector<32x16xf32>
      %23 = arith.addf %17, %22 : vector<32x16xf32>
      %24 = vector.extract_strided_slice %15 {offsets = [0, 0], sizes = [32, 4], strides = [1, 1]} : vector<32x16xf32> to vector<32x4xf32>
      %c0_16 = arith.constant 0 : index
      %c0_17 = arith.constant 0 : index
      %25 = vector.load %arg5[%c0_16, %c0_17] : memref<32x4xf32, #tpu.memory_space<vmem>>, vector<32x4xf32>
      tpu.vector_store %arg5[%c0_16, %c0_17], %24 {strides = array<i32>} : memref<32x4xf32, #tpu.memory_space<vmem>>, vector<32x4xf32>,
      %26 = vector.extract_strided_slice %23 {offsets = [0, 4], sizes = [32, 4], strides = [1, 1]} : vector<32x16xf32> to vector<32x4xf32>
      %c0_18 = arith.constant 0 : index
      %c0_19 = arith.constant 0 : index
      %27 = vector.load %arg6[%c0_18, %c0_19] : memref<32x4xf32, #tpu.memory_space<vmem>>, vector<32x4xf32>
      tpu.vector_store %arg6[%c0_18, %c0_19], %26 {strides = array<i32>} : memref<32x4xf32, #tpu.memory_space<vmem>>, vector<32x4xf32>,
      %28 = vector.extract_strided_slice %23 {offsets = [0, 8], sizes = [32, 4], strides = [1, 1]} : vector<32x16xf32> to vector<32x4xf32>
      %cst_20 = arith.constant 1.000000e+00 : f32
      %29 = vector.broadcast %cst_20 : f32 to vector<32x4xf32>
      %30 = arith.addf %28, %29 : vector<32x4xf32>
      %c0_21 = arith.constant 0 : index
      %c0_22 = arith.constant 0 : index
      %31 = vector.load %arg7[%c0_21, %c0_22] : memref<32x4xf32, #tpu.memory_space<vmem>>, vector<32x4xf32>
      tpu.vector_store %arg7[%c0_21, %c0_22], %30 {strides = array<i32>} : memref<32x4xf32, #tpu.memory_space<vmem>>, vector<32x4xf32>,
      %32 = vector.extract_strided_slice %23 {offsets = [0, 12], sizes = [32, 4], strides = [1, 1]} : vector<32x16xf32> to vector<32x4xf32>
      %c0_23 = arith.constant 0 : index
      %c0_24 = arith.constant 0 : index
      %33 = vector.load %arg8[%c0_23, %c0_24] : memref<32x4xf32, #tpu.memory_space<vmem>>, vector<32x4xf32>
      tpu.vector_store %arg8[%c0_23, %c0_24], %32 {strides = array<i32>} : memref<32x4xf32, #tpu.memory_space<vmem>>, vector<32x4xf32>,
    } else {
    }
    return
  }
  func.func @transform_0(%arg0: i32, %arg1: i32) -> (i32, i32) {
    %c0_i32 = arith.constant 0 : i32
    return %arg0, %arg1 : i32, i32
  }
  func.func @transform_1(%arg0: i32, %arg1: i32) -> (i32, i32) {
    %c0_i32 = arith.constant 0 : i32
    %c0_i32_0 = arith.constant 0 : i32
    return %arg1, %c0_i32 : i32, i32
  }
  func.func @transform_2(%arg0: i32, %arg1: i32) -> (i32, i32) {
    %c0_i32 = arith.constant 0 : i32
    %c0_i32_0 = arith.constant 0 : i32
    %c0_i32_1 = arith.constant 0 : i32
    return %c0_i32, %c0_i32_0 : i32, i32
  }
  func.func @transform_3(%arg0: i32, %arg1: i32) -> (i32, i32) {
    %c0_i32 = arith.constant 0 : i32
    %c0_i32_0 = arith.constant 0 : i32
    return %arg0, %c0_i32 : i32, i32
  }
  func.func @transform_4(%arg0: i32, %arg1: i32) -> (i32, i32) {
    %c0_i32 = arith.constant 0 : i32
    %c0_i32_0 = arith.constant 0 : i32
    return %arg0, %c0_i32 : i32, i32
  }
  func.func @transform_5(%arg0: i32, %arg1: i32) -> (i32, i32) {
    %c0_i32 = arith.constant 0 : i32
    %c0_i32_0 = arith.constant 0 : i32
    return %arg0, %c0_i32 : i32, i32
  }
  func.func @transform_6(%arg0: i32, %arg1: i32) -> (i32, i32) {
    %c0_i32 = arith.constant 0 : i32
    %c0_i32_0 = arith.constant 0 : i32
    return %arg0, %c0_i32 : i32, i32
  }
}

</mosaic_0001>

<bundles_post_ra>
// kernel: linear_normal_gamma.1
= control target key start
LH: loop header
LB: loop body
LE: loop exit
PB: predicated region body
PF: predicated region fallthrough
CT: control target
= control target key end

     0   :  { %s956_s21 = smov 0   ;;  %s958_s22 = smov 0   ;;  %s1059_s0 = inlined_call_operand.vmem [shape: f32[64,32], index: 0, kind: input, shape index: {}]   ;;  %s1060_s1 = inlined_call_operand.vmem [shape: f32[32,16], index: 1, kind: input, shape index: {}]   ;;  %s1061_s2 = inlined_call_operand.vmem [shape: f32[1,16], index: 2, kind: input, shape index: {}]   ;;  %s1062_s3 = inlined_call_operand.vmem [shape: f32[64,4], index: 3, kind: output, shape index: {0}]   ;;  %s1063_s4 = inlined_call_operand.vmem [shape: f32[64,4], index: 4, kind: output, shape index: {1}]   ;;  %s1064_s5 = inlined_call_operand.vmem [shape: f32[64,4], index: 5, kind: output, shape index: {2}]   ;;  %s1065_s6 = inlined_call_operand.vmem [shape: f32[64,4], index: 6, kind: output, shape index: {3}]  }
   0x1   :  { %s960_s23 = smov 0  }
   0x2 LB: > { %s29_s24 = sadd.s32 1, %s911_s22  ;;  %p801_p0 = scmp.ge.s32.totalorder %s915_s23, 1  ;;  %s915_s23 = sphi %s960_s23, %s17_s23   ;;  %s911_s22 = sphi %s958_s22, %s1067_s22   ;;  %s907_s21 = sphi %s956_s21, %s1066_s21  }
   0x3   : > { %p31_p1 = scmp.ge.s32.totalorder %s29_s24, 2  ;;  %p248_p2 = scmp.lt.s32.totalorder %s915_s23, 3 }
   0x5   : > { %s1069_s24 = smov (%p31_p1, %s29_s24), 0  ;;  %p249_p3 = pnand %p801_p0, %p248_p2 }
   0x6   : > { %s802_s29 = sshll.u32 (!%p249_p3), %s907_s21, 2  ;;  %s918_s19 = smov (!%p249_p3), 124  }
   0x7   : > { %252 = sbr.rel (%p249_p3) target bundleno = 406 (0x196), region = 32  ;;  %p302_p4 = scmp.lt.s32.totalorder (!%p249_p3), %s802_s29, 7 }
   0x8   : > { %s919_s20 = smov (!%p249_p3), 116   ;;  %s920_s21 = smov (!%p249_p3), 120  }
   0xc   : > { %v356_v0 = vld [vmem:[%s1060_s1 + $0x18] sm:$0xff]  ;;  %v355_v1 = vld [vmem:[%s1060_s1 + $0x10] sm:$0xff]  ;;  %vm344_vm0 = vcmask 130048   ;;  %v354_v2 = vld [vmem:[%s1060_s1 + $0x8] sm:$0xff]  ;;  %v917_v3 = vmov 0.0   ;;  %s1071_s29 = smov (!%p302_p4, %s802_s29), 7 }
   0xd   : > { %827 = vmatprep.subr.mxu0 %v356_v0  ;;  %841 = vmatprep.subr.mxu1 %v356_v0  ;;  %346 = vst.msk [vmem:[#allocation2 + $0x8] sm:$0xff] %vm344_vm0, %v917_v3  ;;  %345 = vst.msk [vmem:[#allocation2] sm:$0xff] %vm344_vm0, %v917_v3  ;;  %v353_v4 = vld [vmem:[%s1060_s1] sm:$0xff]  ;;  %s990_s10 = sshll.u32 %s1071_s29, 3  ;;  %vm361_vm1 = vcmask 261120   ;;  %vm546_vm2 = vcmask 31744  }
   0xe   : > { %828 = vmatpush3.msra.mxu0 %v356_v0  ;;  %845 = vmatpush3.msra.mxu1 %v356_v0  ;;  %347 = vst.msk [vmem:[#allocation2 + $0x10] sm:$0xff] %vm344_vm0, %v917_v3  ;;  %348 = vst.msk [vmem:[#allocation2 + $0x18] sm:$0xff] %vm344_vm0, %v917_v3  ;;  %s308_s13 = scalar_lea.vmem %s1059_s0, %s990_s10  ;;  %v816_v21 = vld [vmem:[%s1061_s2] ss:$0 sm:$0xff]  ;;  %s320_s18 = scalar_lea.vmem %s1062_s3, %s990_s10 }
   0xf   : > { %829 = vmatprep.subr.mxu0 %v355_v1  ;;  %842 = vmatprep.subr.mxu1 %v355_v1  ;;  %v349_v5 = vld [vmem:[%s308_s13] sm:$0xff]  ;;  %v351_v6 = vld [vmem:[%s308_s13 + $0x10] sm:$0xff]  ;;  %v350_v7 = vld [vmem:[%s308_s13 + $0x8] sm:$0xff]  ;;  %s326_s27 = scalar_lea.vmem %s1063_s4, %s990_s10  ;;  %s338_s30 = scalar_lea.vmem %s1065_s6, %s990_s10 }
  0x10   : > { %830 = vmatpush3.msra.mxu0 %v355_v1  ;;  %846 = vmatpush3.msra.mxu1 %v355_v1  ;;  %v352_v8 = vld [vmem:[%s308_s13 + $0x18] sm:$0xff]  ;;  %s332_s9 = scalar_lea.vmem %s1064_s5, %s990_s10 }
  0x11   : > { %831 = vmatprep.subr.mxu0 %v354_v2  ;;  %843 = vmatprep.subr.mxu1 %v354_v2 }
  0x12   : > { %832 = vmatpush3.msra.mxu0 %v354_v2  ;;  %847 = vmatpush3.msra.mxu1 %v354_v2 }
  0x13   : > { %833 = vmatprep.subr.mxu0 %v353_v4  ;;  %844 = vmatprep.subr.mxu1 %v353_v4 }
  0x14   : > { %834 = vmatpush3.msra.mxu0 %v353_v4  ;;  %848 = vmatpush3.msra.mxu1 %v353_v4  ;;  %v358_v9 = vld [vmem:[#allocation2 + $0x8] sm:$0xff]  ;;  %v357_v13 = vld [vmem:[#allocation2] sm:$0xff] }
  0x15   : > { %835 = vmatprep.mubr.msk.f32.mxu0 %vm361_vm1, %v349_v5  ;;  %838 = vmatprep.mubr.msk.f32.mxu1 %vm361_vm1, %v351_v6  ;;  %v360_v10 = vld [vmem:[#allocation2 + $0x18] sm:$0xff]  ;;  %v359_v14 = vld [vmem:[#allocation2 + $0x10] sm:$0xff] }
  0x16   : > { %836 = vmatmul.mubr.msk.f32.vlgmr.msra.gmra.mxu0 %vm361_vm1, %v350_v7  ;;  %839 = vmatmul.mubr.msk.f32.vlgmr.msra.gmra.mxu1 %vm361_vm1, %v352_v8 }
  0xd6   : > { %v837_v11 = vpop.f32.mrf.mxu0  ;;  %v840_v12 = vpop.f32.mrf.mxu1 }
  0xd7   : > { %v460_v15 = vadd.f32 %v837_v11, %v358_v9  ;;  %v462_v16 = vadd.f32 %v840_v12, %v360_v10 }
  0xd8   : > { %v440_v17 = vpop.f32.mrf.mxu0  ;;  %v450_v18 = vpop.f32.mrf.mxu1 }
  0xd9   : > { %465 = vst.msk [vmem:[#allocation2 + $0x8] sm:$0xff] %vm344_vm0, %v460_v15  ;;  %467 = vst.msk [vmem:[#allocation2 + $0x18] sm:$0xff] %vm344_vm0, %v462_v16  ;;  %v459_v19 = vadd.f32 %v440_v17, %v357_v13  ;;  %v461_v20 = vadd.f32 %v450_v18, %v359_v14 }
  0xdb   : > { %464 = vst.msk [vmem:[#allocation2] sm:$0xff] %vm344_vm0, %v459_v19  ;;  %466 = vst.msk [vmem:[#allocation2 + $0x10] sm:$0xff] %vm344_vm0, %v461_v20 }
  0xe0   : > { %v472_v22 = vld [vmem:[#allocation2 + $0x8] sm:$0xff]  ;;  %v474_v23 = vld [vmem:[#allocation2 + $0x18] sm:$0xff] }
  0xe1   : > { %v483_v24 = vadd.f32 %v816_v21, %v472_v22  ;;  %v1003_v25 = vadd.f32 %v816_v21, %v474_v23 }
  0xe2   : > { %v471_v26 = vld [vmem:[#allocation2] sm:$0xff]  ;;  %v473_v27 = vld [vmem:[#allocation2 + $0x10] sm:$0xff] }
  0xe3   : > { %v491_v28 = vand.u32 2147483647, %v483_v24  ;;  %v1009_v29 = vadd.f32 %v816_v21, %v471_v26  ;;  %v493_v30 = vand.u32 2147483647, %v1003_v25  ;;  %v1012_v31 = vadd.f32 %v816_v21, %v473_v27  ;;  %548 = vst.msk [vmem:[%s320_s18 + $0x8] sm:$0xff] %vm546_vm2, %v483_v24  ;;  %550 = vst.msk [vmem:[%s320_s18 + $0x18] sm:$0xff] %vm546_vm2, %v1003_v25 }
  0xe4   : > { %v487_v63 = vmax.f32 %v483_v24, 0.0  ;;  %v489_v18 = vmax.f32 %v1003_v25, 0.0 }
  0xe5   : > { %v495_v32 = vsub.f32 0.0, %v491_v28  ;;  %v490_v33 = vand.u32 2147483647, %v1009_v29  ;;  %547 = vst.msk [vmem:[%s320_s18] sm:$0xff] %vm546_vm2, %v1009_v29  ;;  %v497_v34 = vsub.f32 0.0, %v493_v30  ;;  %549 = vst.msk [vmem:[%s320_s18 + $0x10] sm:$0xff] %vm546_vm2, %v1012_v31 }
  0xe6   : > { %v492_v35 = vand.u32 2147483647, %v1012_v31  ;;  %v486_v6 = vmax.f32 %v1009_v29, 0.0  ;;  %v488_v21 = vmax.f32 %v1012_v31, 0.0 }
  0xe7   : > { %v500_v36 = vmul.f32 1.442695, %v495_v32  ;;  %v494_v37 = vsub.f32 0.0, %v490_v33  ;;  %v504_v38 = vmul.f32 1.442695, %v497_v34 }
  0xe8   : > { %v496_v39 = vsub.f32 0.0, %v492_v35 }
  0xe9   : > { %877 = vpow2.f32 %v500_v36  ;;  %v498_v40 = vmul.f32 1.442695, %v494_v37 }
  0xea   : > { %879 = vpow2.f32 %v504_v38  ;;  %v502_v41 = vmul.f32 1.442695, %v496_v39 }
  0xeb   : > { %881 = vpow2.f32 %v498_v40 }
  0xec   : > { %883 = vpow2.f32 %v502_v41 }
  0xf6   : > { %v878_v42 = vpop.eup %877 }
  0xf7   : > { %v880_v43 = vpop.eup %879  ;;  %v515_v44 = vadd.f32 1.0, %v878_v42  ;;  %v518_v50 = vmul.f32 -0.5, %v878_v42  ;;  %v521_v53 = vand.u32 2147483647, %v878_v42 }
  0xf8   : > { %v882_v45 = vpop.eup %881  ;;  %v533_v46 = vadd.f32 1.0, %v880_v43  ;;  %v536_v55 = vmul.f32 -0.5, %v880_v43  ;;  %v539_v7 = vand.u32 2147483647, %v880_v43 }
  0xf9   : > { %v884_v47 = vpop.eup %883  ;;  %885 = vlog2.f32 %v515_v44  ;;  %v506_v48 = vadd.f32 1.0, %v882_v45  ;;  %v509_v51 = vmul.f32 -0.5, %v882_v45  ;;  %v519_v52 = vadd.f32 1.0, %v518_v50 }
  0xfa   : > { %887 = vlog2.f32 %v533_v46  ;;  %v524_v49 = vadd.f32 1.0, %v884_v47  ;;  %v512_v57 = vand.u32 2147483647, %v882_v45  ;;  %v527_v61 = vmul.f32 -0.5, %v884_v47 }
  0xfb   : > { %889 = vlog2.f32 %v506_v48  ;;  %v510_v54 = vadd.f32 1.0, %v509_v51  ;;  %v520_v60 = vmul.f32 %v878_v42, %v519_v52  ;;  %vm522_vm3 = vcmp.lt.f32.partialorder %v521_v53, 0.0004427343 }
  0xfc   : > { %891 = vlog2.f32 %v524_v49  ;;  %v537_v3 = vadd.f32 1.0, %v536_v55  ;;  %vm513_vm4 = vcmp.lt.f32.partialorder %v512_v57, 0.0004427343  ;;  %v528_v10 = vadd.f32 1.0, %v527_v61 }
  0xfd   : > { %v511_v2 = vmul.f32 %v882_v45, %v510_v54  ;;  %v530_v12 = vand.u32 2147483647, %v884_v47  ;;  %vm540_vm5 = vcmp.lt.f32.partialorder %v539_v7, 0.0004427343 }
  0xfe   : > { %v538_v13 = vmul.f32 %v880_v43, %v537_v3  ;;  %v529_v16 = vmul.f32 %v884_v47, %v528_v10 }
  0xff   : > { %vm531_vm6 = vcmp.lt.f32.partialorder %v530_v12, 0.0004427343 }
 0x106   : > { %v886_v56 = vpop.eup %885 }
 0x107   : > { %v888_v58 = vpop.eup %887  ;;  %v517_v59 = vmul.f32 0.6931472, %v886_v56 }
 0x108   : > { %v890_v62 = vpop.eup %889  ;;  %v535_v9 = vmul.f32 0.6931472, %v888_v58 }
 0x109   : > { %v523_v0 = vsel %vm522_vm3, %v520_v60, %v517_v59  ;;  %v508_v1 = vmul.f32 0.6931472, %v890_v62  ;;  %v892_v4 = vpop.eup %891 }
 0x10a   : > { %v543_v5 = vadd.f32 %v523_v0, %v487_v63  ;;  %v526_v14 = vmul.f32 0.6931472, %v892_v4  ;;  %v541_v15 = vsel %vm540_vm5, %v538_v13, %v535_v9 }
 0x10b   : > { %v514_v8 = vsel %vm513_vm4, %v511_v2, %v508_v1  ;;  %v545_v20 = vadd.f32 %v541_v15, %v489_v18 }
 0x10c   : > { %557 = vrot.lane.b32.xlu1 %v543_v5, %s918_s19  ;;  %v542_v11 = vadd.f32 %v514_v8, %v486_v6  ;;  %v572_v17 = vadd.f32 1.0, %v543_v5  ;;  %v532_v19 = vsel %vm531_vm6, %v529_v16, %v526_v14 }
 0x10d   : > { %v544_v22 = vadd.f32 %v532_v19, %v488_v21  ;;  %v574_v25 = vadd.f32 1.0, %v545_v20 }
 0x10e   : > { %555 = vrot.lane.b32.xlu0 %v542_v11, %s918_s19  ;;  %v571_v24 = vadd.f32 1.0, %v542_v11 }
 0x10f   : > { %v573_v23 = vadd.f32 1.0, %v544_v22 }
 0x110   : > { %597 = vrot.lane.b32.xlu1 %v543_v5, %s919_s20 }
 0x112   : > { %581 = vrot.lane.b32.xlu0 %v572_v17, %s920_s21 }
 0x114   : > { %561 = vrot.lane.b32.xlu1 %v545_v20, %s918_s19 }
 0x116   : > { %559 = vrot.lane.b32.xlu0 %v544_v22, %s918_s19 }
 0x118   : > { %595 = vrot.lane.b32.xlu1 %v542_v11, %s919_s20 }
 0x11a   : > { %599 = vrot.lane.b32.xlu0 %v544_v22, %s919_s20 }
 0x11c   : > { %583 = vrot.lane.b32.xlu1 %v573_v23, %s920_s21 }
 0x11e   : > { %579 = vrot.lane.b32.xlu0 %v571_v24, %s920_s21 }
 0x120   : > { %601 = vrot.lane.b32.xlu1 %v545_v20, %s919_s20 }
 0x122   : > { %585 = vrot.lane.b32.xlu0 %v574_v25, %s920_s21 }
 0x17e   : > { %v558_v26 = vpop.permute.xlu1 %557 }
 0x17f   : > { %568 = vst.msk [vmem:[%s326_s27 + $0x8] sm:$0xff] %vm546_vm2, %v558_v26 }
 0x180   : > { %v556_v27 = vpop.permute.xlu0 %555 }
 0x181   : > { %567 = vst.msk [vmem:[%s326_s27] sm:$0xff] %vm546_vm2, %v556_v27 }
 0x182   : > { %v598_v28 = vpop.permute.xlu1 %597 }
 0x183   : > { %608 = vst.msk [vmem:[%s338_s30 + $0x8] sm:$0xff] %vm546_vm2, %v598_v28 }
 0x184   : > { %v582_v29 = vpop.permute.xlu0 %581 }
 0x185   : > { %592 = vst.msk [vmem:[%s332_s9 + $0x8] sm:$0xff] %vm546_vm2, %v582_v29 }
 0x186   : > { %v562_v30 = vpop.permute.xlu1 %561 }
 0x187   : > { %570 = vst.msk [vmem:[%s326_s27 + $0x18] sm:$0xff] %vm546_vm2, %v562_v30 }
 0x188   : > { %v560_v31 = vpop.permute.xlu0 %559 }
 0x189   : > { %569 = vst.msk [vmem:[%s326_s27 + $0x10] sm:$0xff] %vm546_vm2, %v560_v31 }
 0x18a   : > { %v596_v32 = vpop.permute.xlu1 %595 }
 0x18b   : > { %607 = vst.msk [vmem:[%s338_s30] sm:$0xff] %vm546_vm2, %v596_v32 }
 0x18c   : > { %v600_v33 = vpop.permute.xlu0 %599 }
 0x18d   : > { %609 = vst.msk [vmem:[%s338_s30 + $0x10] sm:$0xff] %vm546_vm2, %v600_v33 }
 0x18e   : > { %v584_v34 = vpop.permute.xlu1 %583 }
 0x18f   : > { %593 = vst.msk [vmem:[%s332_s9 + $0x10] sm:$0xff] %vm546_vm2, %v584_v34 }
 0x190   : > { %v580_v35 = vpop.permute.xlu0 %579 }
 0x191   : > { %591 = vst.msk [vmem:[%s332_s9] sm:$0xff] %vm546_vm2, %v580_v35 }
 0x192   : > { %v602_v36 = vpop.permute.xlu1 %601 }
 0x193   : > { %610 = vst.msk [vmem:[%s338_s30 + $0x18] sm:$0xff] %vm546_vm2, %v602_v36 }
 0x194   : > { %v586_v37 = vpop.permute.xlu0 %585 }
 0x195   : > { %594 = vst.msk [vmem:[%s332_s9 + $0x18] sm:$0xff] %vm546_vm2, %v586_v37 }
 0x196 PF: > { %s17_s23 = sadd.s32 1, %s915_s23   ;;  %s1066_s21 = smov %s911_s22 }
 0x197   : > { %p14_p5 = scmp.ge.s32.totalorder %s17_s23, 4   ;;  %s1067_s22 = smov %s1069_s24 }
 0x199   :  { %16 = sbr.rel (!%p14_p5) target bundleno = 2 (0x2), region = 109 }

</bundles_post_ra>
